<compile_context>
chip_gen: v7x
topology: tpu7x:2x2x1
jax: 0.10.0
libtpu: 0.0.40
codegen_flags: <defaults>
</compile_context>

<pallas_src>
import math

import numpy as np
import jax
import jax.numpy as jnp
from jax.experimental import pallas as pl
from jax.experimental.pallas import tpu as pltpu


# ----------------------------------------------------------------------------
# Host-side constant masks for the flat "group sum":
#   group c sums v_flat[c*N : (c+1)*N]  of v (N, C) row-major.
# With a[k] = (k*N)//C, b[k] = (k*N)%C:
#   group_sum[c] =   sum_{a[c] <= n < a[c+1]} rowsum_v[n]          (full rows)
#                  + prefix(v[a[c+1], :], b[c+1])                   (top edge)
#                  - prefix(v[a[c],   :], b[c])                     (bottom edge)
# All four selector matrices keep the output index c on the LANE axis, so the
# kernel needs only standard dots, elementwise ops and a lane reduction.
# ----------------------------------------------------------------------------
def _group_sum_masks(n_tokens, channels):
    n, c = n_tokens, channels
    k = np.arange(c + 1, dtype=np.int64)
    a = (k * n) // c                       # (c+1,)
    b = (k * n) % c                        # (c+1,)
    rows = np.arange(n, dtype=np.int64)[:, None]   # (n, 1)
    cols = np.arange(c, dtype=np.int64)[:, None]   # (c, 1)
    a_lo, a_hi = a[:-1][None, :], a[1:][None, :]   # (1, c)
    b_lo, b_hi = b[:-1][None, :], b[1:][None, :]   # (1, c)

    ad = ((rows >= a_lo) & (rows < a_hi)).astype(np.float32)        # (n, c) full rows
    r1 = (rows == a_lo).astype(np.float32)                          # (n, c) bottom-edge row
    r2 = ((rows == a_hi) & (a_hi < n)).astype(np.float32)           # (n, c) top-edge row
    t1 = (cols < b_lo).astype(np.float32)                           # (c, c) prefix width b[c]
    t2 = (cols < b_hi).astype(np.float32)                           # (c, c) prefix width b[c+1]
    return (jnp.asarray(ad), jnp.asarray(r1), jnp.asarray(r2),
            jnp.asarray(t1), jnp.asarray(t2))


# ----------------------------------------------------------------------------
# Fused kernel: per batch element
#   v = x_b @ Wv^T   (VMEM only, never written to HBM)
#   m = flat-view group means of v        (mask-matmul formulation, no reshape)
#   out_row = m @ (Wproj^T / N) + bias    (1/N folded into the weight on host)
#   write out_row broadcast to all N token rows.
# ----------------------------------------------------------------------------
def _lmsa_fused_kernel(x_ref, wvt_ref, ad_ref, r1_ref, r2_ref, t1_ref, t2_ref,
                       wps_ref, bias_ref, o_ref):
    xb = x_ref[0]                                                    # (N, C)
    v = jnp.dot(xb, wvt_ref[...], preferred_element_type=jnp.float32)  # (N, C) f32

    row_sum = jnp.sum(v, axis=-1, keepdims=True)                     # (N, 1)
    ps_lo = jnp.dot(v, t1_ref[...], preferred_element_type=jnp.float32)  # (N, C)
    ps_hi = jnp.dot(v, t2_ref[...], preferred_element_type=jnp.float32)  # (N, C)

    contrib = (ad_ref[...] * row_sum
               + r2_ref[...] * ps_hi
               - r1_ref[...] * ps_lo)                                # (N, C)

    n = contrib.shape[0]
    # Sum over tokens (sublanes) as an MXU contraction -> lane-major (1, C) row.
    group_sums = jnp.dot(jnp.ones((1, n), jnp.float32), contrib,
                         preferred_element_type=jnp.float32)         # (1, C)

    out_row = jnp.dot(group_sums, wps_ref[...],
                      preferred_element_type=jnp.float32) + bias_ref[...]   # (1, C)

    # Uniform attention: every token of this batch element gets the same row.
    o_ref[...] = jnp.broadcast_to(out_row[None], o_ref.shape).astype(o_ref.dtype)


def lmsa_pallas(x, params, num_heads, *, use_bf16=True):
    """x: (B, N, C).  Returns (B, N, C); if B == 1 also returns attn (uniform 1/N)."""
    B, N, C = x.shape

    wvt = params["v_weight"].T                       # (C_in, C_out) so v = x @ wvt
    wps = params["proj_weight"].T / float(N)         # fold uniform-attn 1/N into Wproj^T
    bias_row = params["proj_bias"].reshape(1, C)
    ad, r1t, r2t, t1, t2 = _group_sum_masks(N, C)

    if use_bf16:
        # bf16 matmul inputs (f32 accumulate) halve the dominant x DMA bytes and
        # double MXU rate on v6e/v7x; reduction/projection constants stay f32.
        x_in = x.astype(jnp.bfloat16)
        wvt_in = wvt.astype(jnp.bfloat16)
    else:
        x_in, wvt_in = x, wvt

    # Explicit scoped-VMEM budget (double-buffered blocks + resident constants),
    # clamped well inside v7x's 64 MiB per-TC VMEM.
    in_bytes = x_in.dtype.itemsize
    est = (2 * (N * C * in_bytes + N * C * 4)                 # x block + out block
           + 2 * (C * C * in_bytes + 3 * C * C * 4            # WvT, T1, T2, Wps
                  + 3 * N * C * 4 + C * 4))                   # AD, R1, R2, bias
    vmem_limit = int(min(max(4 * est + (1 << 20), 16 * 1024 * 1024),
                         64 * 1024 * 1024))

    out = pl.pallas_call(
        _lmsa_fused_kernel,
        out_shape=jax.ShapeDtypeStruct((B, N, C), x.dtype),
        grid_spec=pltpu.PrefetchScalarGridSpec(
            num_scalar_prefetch=0,
            grid=(B,),
            in_specs=[
                pl.BlockSpec((1, N, C), lambda b: (b, 0, 0)),   # x (per batch)
                pl.BlockSpec((C, C), lambda b: (0, 0)),         # Wv^T (resident)
                pl.BlockSpec((N, C), lambda b: (0, 0)),         # AD
                pl.BlockSpec((N, C), lambda b: (0, 0)),         # R1
                pl.BlockSpec((N, C), lambda b: (0, 0)),         # R2
                pl.BlockSpec((C, C), lambda b: (0, 0)),         # T1
                pl.BlockSpec((C, C), lambda b: (0, 0)),         # T2
                pl.BlockSpec((C, C), lambda b: (0, 0)),         # Wproj^T / N
                pl.BlockSpec((1, C), lambda b: (0, 0)),         # bias row
            ],
            out_specs=pl.BlockSpec((1, N, C), lambda b: (b, 0, 0)),
        ),
        compiler_params=pltpu.CompilerParams(
            dimension_semantics=("parallel",),
            vmem_limit_bytes=vmem_limit,
        ),
    )(x_in, wvt_in, ad, r1t, r2t, t1, t2, wps, bias_row)

    if B == 1:
        # Post-softmax attention returned by the module for B == 1 is exactly
        # uniform 1/N (softmax over a constant axis); attn_drop is identity.
        attn = jnp.full((B, num_heads, N, N), 1.0 / N, dtype=jnp.float32)
        return out, attn
    return out


# ----------------------------------------------------------------------------
# Pure-JAX reference: the FULL PyTorch forward, including the conv/sigmoid
# gate, the (N, N) expand, the softmax and the attn @ v matmul.
# ----------------------------------------------------------------------------
def lmsa_ref(x, params, num_heads):
    B, N, C = x.shape
    l = int(math.isqrt(N))
    hd = C // num_heads

    att = params["att_token"]                                # (H, C, 3, 3)
    wq = params["q_weight"][:, :, 0, 0]                      # (C, C)
    wk = params["k_weight"][:, :, 0, 0]
    kernel_q = jnp.einsum("oc,hcxy->hoxy", wq, att) + params["q_bias"][None, :, None, None]
    kernel_k = jnp.einsum("oc,hcxy->hoxy", wk, att) + params["k_bias"][None, :, None, None]

    x_img = jnp.transpose(x, (0, 2, 1)).reshape(B, C, l, l)
    conv_q = jax.lax.conv_general_dilated(
        x_img, kernel_q, (1, 1), ((1, 1), (1, 1)),
        dimension_numbers=("NCHW", "OIHW", "NCHW"))
    conv_k = jax.lax.conv_general_dilated(
        x_img, kernel_k, (1, 1), ((1, 1), (1, 1)),
        dimension_numbers=("NCHW", "OIHW", "NCHW"))
    gate = jax.nn.sigmoid(conv_q * conv_k).reshape(B, num_heads, N)

    attn = jnp.broadcast_to(gate[..., None], (B, num_heads, N, N))
    attn = jax.nn.softmax(attn, axis=-1)                     # attn_drop = identity

    x_tok = jnp.transpose(x_img, (0, 2, 3, 1)).reshape(B, N, C)
    v = x_tok @ params["v_weight"].T                         # qkv_bias=False
    v = v.reshape(B, num_heads, hd, N).transpose(0, 1, 3, 2)  # the module's odd view

    out = attn @ v                                           # (B, H, N, hd)
    out = out.transpose(0, 2, 1, 3).reshape(B, N, C)
    out = out @ params["proj_weight"].T + params["proj_bias"]  # proj_drop = identity
    if B == 1:
        return out, attn
    return out


if __name__ == "__main__":
    # Small shapes consistent with the module: dim divisible by num_heads,
    # N a perfect square.
    B, N, C, num_heads = 2, 16, 32, 4          # l = 4, head_dim = 8

    key = jax.random.PRNGKey(0)
    ks = jax.random.split(key, 9)
    x = jax.random.normal(ks[0], (B, N, C), dtype=jnp.float32)

    params = {
        # trunc_normal_(std=0.02) approximated by a clipped normal.
        "att_token": jnp.clip(
            jax.random.normal(ks[1], (num_heads, C, 3, 3), jnp.float32) * 0.02,
            -0.04, 0.04),
        "q_weight": jax.random.normal(ks[2], (C, C, 1, 1), jnp.float32) * 0.05,
        "q_bias": jax.random.normal(ks[3], (C,), jnp.float32) * 0.05,
        "k_weight": jax.random.normal(ks[4], (C, C, 1, 1), jnp.float32) * 0.05,
        "k_bias": jax.random.normal(ks[5], (C,), jnp.float32) * 0.05,
        "v_weight": jax.random.normal(ks[6], (C, C), jnp.float32) * 0.05,
        "proj_weight": jax.random.normal(ks[7], (C, C), jnp.float32) * 0.05,
        "proj_bias": jax.random.normal(ks[8], (C,), jnp.float32) * 0.05,
    }

    ref = lmsa_ref(x, params, num_heads)

    # f32-input path: tight tolerance against the full-path reference.
    out_f32 = jax.block_until_ready(lmsa_pallas(x, params, num_heads, use_bf16=False))
    assert out_f32.shape == (B, N, C), out_f32.shape
    assert jnp.allclose(out_f32, ref, atol=1e-4, rtol=1e-4), \
        float(jnp.max(jnp.abs(out_f32 - ref)))

    # Default (bf16 matmul inputs, f32 accumulate): looser tolerance.
    out_bf16 = jax.block_until_ready(lmsa_pallas(x, params, num_heads))
    assert out_bf16.shape == (B, N, C), out_bf16.shape
    assert jnp.allclose(out_bf16, ref, atol=2e-2, rtol=2e-2), \
        float(jnp.max(jnp.abs(out_bf16 - ref)))

    # B == 1 branch (also returns the uniform attention matrix).
    x1 = x[:1]
    out1, attn1 = lmsa_pallas(x1, params, num_heads, use_bf16=False)
    out1 = jax.block_until_ready(out1)
    ref1, attn_ref1 = lmsa_ref(x1, params, num_heads)
    assert jnp.allclose(out1, ref1, atol=1e-4, rtol=1e-4)
    assert jnp.allclose(attn1, attn_ref1, atol=1e-6)

    print("KERNEL_OK")
</pallas_src>

<mosaic_0001>
module attributes {stable_mosaic.version = 11 : i64} {
  func.func @_lmsa_fused_kernel(%arg0: i32, %arg1: memref<1x16x32xf32, #tpu.memory_space<vmem>>, %arg2: memref<32x32xf32, #tpu.memory_space<vmem>>, %arg3: memref<16x32xf32, #tpu.memory_space<vmem>>, %arg4: memref<16x32xf32, #tpu.memory_space<vmem>>, %arg5: memref<16x32xf32, #tpu.memory_space<vmem>>, %arg6: memref<32x32xf32, #tpu.memory_space<vmem>>, %arg7: memref<32x32xf32, #tpu.memory_space<vmem>>, %arg8: memref<32x32xf32, #tpu.memory_space<vmem>>, %arg9: memref<1x32xf32, #tpu.memory_space<vmem>>, %arg10: memref<1x16x32xf32, #tpu.memory_space<vmem>>) attributes {dimension_semantics = [#tpu.dimension_semantics<parallel>], iteration_bounds = array<i64: 2>, scalar_prefetch = 0 : i64, scratch_operands = 0 : i64, tpu.core_type = #tpu.core_type<tc>, window_params = [{transform_indices = @transform_0, window_bounds = array<i64: 1, 16, 32>}, {pipeline_mode = #tpu.pipeline_mode<synchronous>, transform_indices = @transform_1, window_bounds = array<i64: 32, 32>}, {pipeline_mode = #tpu.pipeline_mode<synchronous>, transform_indices = @transform_2, window_bounds = array<i64: 16, 32>}, {pipeline_mode = #tpu.pipeline_mode<synchronous>, transform_indices = @transform_3, window_bounds = array<i64: 16, 32>}, {pipeline_mode = #tpu.pipeline_mode<synchronous>, transform_indices = @transform_4, window_bounds = array<i64: 16, 32>}, {pipeline_mode = #tpu.pipeline_mode<synchronous>, transform_indices = @transform_5, window_bounds = array<i64: 32, 32>}, {pipeline_mode = #tpu.pipeline_mode<synchronous>, transform_indices = @transform_6, window_bounds = array<i64: 32, 32>}, {pipeline_mode = #tpu.pipeline_mode<synchronous>, transform_indices = @transform_7, window_bounds = array<i64: 32, 32>}, {pipeline_mode = #tpu.pipeline_mode<synchronous>, transform_indices = @transform_8, window_bounds = array<i64: 1, 32>}, {transform_indices = @transform_9, window_bounds = array<i64: 1, 16, 32>}]} {
    %c0 = arith.constant 0 : index
    %c0_0 = arith.constant 0 : index
    %c0_1 = arith.constant 0 : index
    %0 = vector.load %arg1[%c0, %c0_0, %c0_1] : memref<1x16x32xf32, #tpu.memory_space<vmem>>, vector<1x16x32xf32>
    %1 = vector.shape_cast %0 : vector<1x16x32xf32> to vector<16x32xf32>
    %c0_2 = arith.constant 0 : index
    %c0_3 = arith.constant 0 : index
    %2 = vector.load %arg2[%c0_2, %c0_3] : memref<32x32xf32, #tpu.memory_space<vmem>>, vector<32x32xf32>
    %cst = arith.constant dense<0.000000e+00> : vector<16x32xf32>
    %3 = tpu.matmul %1, %2, %cst {dimension_numbers = #tpu.dot_dimension_numbers<[1], [0], [0], [1], [0, 0, 1, 1], [], []>} : vector<16x32xf32>, vector<32x32xf32>, vector<16x32xf32> -> vector<16x32xf32>
    %cst_4 = arith.constant dense<0.000000e+00> : vector<16xf32>
    %4 = vector.multi_reduction <add>, %3, %cst_4 [1] : vector<16x32xf32> to vector<16xf32>
    %5 = vector.shape_cast %4 : vector<16xf32> to vector<16x1xf32>
    %c0_5 = arith.constant 0 : index
    %c0_6 = arith.constant 0 : index
    %6 = vector.load %arg6[%c0_5, %c0_6] : memref<32x32xf32, #tpu.memory_space<vmem>>, vector<32x32xf32>
    %cst_7 = arith.constant dense<0.000000e+00> : vector<16x32xf32>
    %7 = tpu.matmul %3, %6, %cst_7 {dimension_numbers = #tpu.dot_dimension_numbers<[1], [0], [0], [1], [0, 0, 1, 1], [], []>} : vector<16x32xf32>, vector<32x32xf32>, vector<16x32xf32> -> vector<16x32xf32>
    %c0_8 = arith.constant 0 : index
    %c0_9 = arith.constant 0 : index
    %8 = vector.load %arg7[%c0_8, %c0_9] : memref<32x32xf32, #tpu.memory_space<vmem>>, vector<32x32xf32>
    %cst_10 = arith.constant dense<0.000000e+00> : vector<16x32xf32>
    %9 = tpu.matmul %3, %8, %cst_10 {dimension_numbers = #tpu.dot_dimension_numbers<[1], [0], [0], [1], [0, 0, 1, 1], [], []>} : vector<16x32xf32>, vector<32x32xf32>, vector<16x32xf32> -> vector<16x32xf32>
    %c0_11 = arith.constant 0 : index
    %c0_12 = arith.constant 0 : index
    %10 = vector.load %arg3[%c0_11, %c0_12] : memref<16x32xf32, #tpu.memory_space<vmem>>, vector<16x32xf32>
    %11 = vector.broadcast %5 : vector<16x1xf32> to vector<16x32xf32>
    %12 = arith.mulf %10, %11 : vector<16x32xf32>
    %c0_13 = arith.constant 0 : index
    %c0_14 = arith.constant 0 : index
    %13 = vector.load %arg5[%c0_13, %c0_14] : memref<16x32xf32, #tpu.memory_space<vmem>>, vector<16x32xf32>
    %14 = arith.mulf %13, %9 : vector<16x32xf32>
    %15 = arith.addf %12, %14 : vector<16x32xf32>
    %c0_15 = arith.constant 0 : index
    %c0_16 = arith.constant 0 : index
    %16 = vector.load %arg4[%c0_15, %c0_16] : memref<16x32xf32, #tpu.memory_space<vmem>>, vector<16x32xf32>
    %17 = arith.mulf %16, %7 : vector<16x32xf32>
    %18 = arith.subf %15, %17 : vector<16x32xf32>
    %cst_17 = arith.constant 1.000000e+00 : f32
    %19 = vector.broadcast %cst_17 : f32 to vector<1x16xf32>
    %cst_18 = arith.constant dense<0.000000e+00> : vector<1x32xf32>
    %20 = tpu.matmul %19, %18, %cst_18 {dimension_numbers = #tpu.dot_dimension_numbers<[1], [0], [0], [1], [0, 0, 1, 1], [], []>} : vector<1x16xf32>, vector<16x32xf32>, vector<1x32xf32> -> vector<1x32xf32>
    %c0_19 = arith.constant 0 : index
    %c0_20 = arith.constant 0 : index
    %21 = vector.load %arg8[%c0_19, %c0_20] : memref<32x32xf32, #tpu.memory_space<vmem>>, vector<32x32xf32>
    %cst_21 = arith.constant dense<0.000000e+00> : vector<1x32xf32>
    %22 = tpu.matmul %20, %21, %cst_21 {dimension_numbers = #tpu.dot_dimension_numbers<[1], [0], [0], [1], [0, 0, 1, 1], [], []>} : vector<1x32xf32>, vector<32x32xf32>, vector<1x32xf32> -> vector<1x32xf32>
    %c0_22 = arith.constant 0 : index
    %c0_23 = arith.constant 0 : index
    %23 = vector.load %arg9[%c0_22, %c0_23] : memref<1x32xf32, #tpu.memory_space<vmem>>, vector<1x32xf32>
    %24 = arith.addf %22, %23 : vector<1x32xf32>
    %25 = vector.shape_cast %24 : vector<1x32xf32> to vector<1x1x32xf32>
    %26 = vector.shape_cast %25 : vector<1x1x32xf32> to vector<1x1x32xf32>
    %27 = vector.broadcast %26 : vector<1x1x32xf32> to vector<1x16x32xf32>
    %c0_24 = arith.constant 0 : index
    %c0_25 = arith.constant 0 : index
    %c0_26 = arith.constant 0 : index
    %28 = vector.load %arg10[%c0_24, %c0_25, %c0_26] : memref<1x16x32xf32, #tpu.memory_space<vmem>>, vector<1x16x32xf32>
    tpu.vector_store %arg10[%c0_24, %c0_25, %c0_26], %27 {strides = array<i32>} : memref<1x16x32xf32, #tpu.memory_space<vmem>>, vector<1x16x32xf32>,
    return
  }
  func.func @transform_0(%arg0: i32) -> (i32, i32, i32) {
    %c0_i32 = arith.constant 0 : i32
    %c0_i32_0 = arith.constant 0 : i32
    %c0_i32_1 = arith.constant 0 : i32
    return %arg0, %c0_i32, %c0_i32_0 : i32, i32, i32
  }
  func.func @transform_1(%arg0: i32) -> (i32, i32) {
    %c0_i32 = arith.constant 0 : i32
    %c0_i32_0 = arith.constant 0 : i32
    %c0_i32_1 = arith.constant 0 : i32
    return %c0_i32, %c0_i32_0 : i32, i32
  }
  func.func @transform_2(%arg0: i32) -> (i32, i32) {
    %c0_i32 = arith.constant 0 : i32
    %c0_i32_0 = arith.constant 0 : i32
    %c0_i32_1 = arith.constant 0 : i32
    return %c0_i32, %c0_i32_0 : i32, i32
  }
  func.func @transform_3(%arg0: i32) -> (i32, i32) {
    %c0_i32 = arith.constant 0 : i32
    %c0_i32_0 = arith.constant 0 : i32
    %c0_i32_1 = arith.constant 0 : i32
    return %c0_i32, %c0_i32_0 : i32, i32
  }
  func.func @transform_4(%arg0: i32) -> (i32, i32) {
    %c0_i32 = arith.constant 0 : i32
    %c0_i32_0 = arith.constant 0 : i32
    %c0_i32_1 = arith.constant 0 : i32
    return %c0_i32, %c0_i32_0 : i32, i32
  }
  func.func @transform_5(%arg0: i32) -> (i32, i32) {
    %c0_i32 = arith.constant 0 : i32
    %c0_i32_0 = arith.constant 0 : i32
    %c0_i32_1 = arith.constant 0 : i32
    return %c0_i32, %c0_i32_0 : i32, i32
  }
  func.func @transform_6(%arg0: i32) -> (i32, i32) {
    %c0_i32 = arith.constant 0 : i32
    %c0_i32_0 = arith.constant 0 : i32
    %c0_i32_1 = arith.constant 0 : i32
    return %c0_i32, %c0_i32_0 : i32, i32
  }
  func.func @transform_7(%arg0: i32) -> (i32, i32) {
    %c0_i32 = arith.constant 0 : i32
    %c0_i32_0 = arith.constant 0 : i32
    %c0_i32_1 = arith.constant 0 : i32
    return %c0_i32, %c0_i32_0 : i32, i32
  }
  func.func @transform_8(%arg0: i32) -> (i32, i32) {
    %c0_i32 = arith.constant 0 : i32
    %c0_i32_0 = arith.constant 0 : i32
    %c0_i32_1 = arith.constant 0 : i32
    return %c0_i32, %c0_i32_0 : i32, i32
  }
  func.func @transform_9(%arg0: i32) -> (i32, i32, i32) {
    %c0_i32 = arith.constant 0 : i32
    %c0_i32_0 = arith.constant 0 : i32
    %c0_i32_1 = arith.constant 0 : i32
    return %arg0, %c0_i32, %c0_i32_0 : i32, i32, i32
  }
}

</mosaic_0001>

<bundles_post_ra>
// kernel: tpu_custom_call.1
= control target key start
LH: loop header
LB: loop body
LE: loop exit
PB: predicated region body
PF: predicated region fallthrough
CT: control target
= control target key end

     0   :  { %s2078_s0 = inlined_call_operand.hbm [shape: f32[2,16,32], index: 0, kind: input, shape index: {}]   ;;  %s2079_s1 = inlined_call_operand.hbm [shape: f32[32,32], index: 1, kind: input, shape index: {}]   ;;  %s2080_s2 = inlined_call_operand.hbm [shape: f32[16,32], index: 2, kind: input, shape index: {}]   ;;  %s2081_s3 = inlined_call_operand.hbm [shape: f32[16,32], index: 3, kind: input, shape index: {}]   ;;  %s2082_s4 = inlined_call_operand.hbm [shape: f32[16,32], index: 4, kind: input, shape index: {}]   ;;  %s2083_s5 = inlined_call_operand.hbm [shape: f32[32,32], index: 5, kind: input, shape index: {}]   ;;  %s2084_s6 = inlined_call_operand.hbm [shape: f32[32,32], index: 6, kind: input, shape index: {}]   ;;  %s2085_s7 = inlined_call_operand.hbm [shape: f32[32,32], index: 7, kind: input, shape index: {}]   ;;  %s2086_s8 = inlined_call_operand.vmem [shape: f32[1,32], index: 8, kind: input, shape index: {}]   ;;  %s2087_s9 = inlined_call_operand.hbm [shape: f32[2,16,32], index: 9, kind: output, shape index: {}]  }
   0x1   :  { %2093 = sst [smem:[#allocation23_spill]] %s2079_s1 }
   0x2   :  { %2094 = sst [smem:[#allocation24_spill]] %s2087_s9 }
   0x3   :  { %14 = vsyncpa [#allocation3], 0 }
   0x4   :  { %16 = vsyncpa [#allocation3 + $0x1], 0 }
   0x5   :  { %17 = vsyncpa [#allocation6], 0 }
   0x6   :  { %18 = vsyncpa [#allocation9], 0 }
   0x7   :  { %19 = vsyncpa [#allocation12], 0 }
   0x8   :  { %20 = vsyncpa [#allocation15], 0 }
   0x9   :  { %21 = vsyncpa [#allocation4], 0 }
   0xa   :  { %23 = vsyncpa [#allocation4 + $0x1], 0  ;;  %s1689_s30 = smov 0   ;;  %s1691_s10 = smov 0  }
   0xb   :  { %s1693_s11 = smov 0   ;;  %s1695_s12 = smov 0  }
   0xc LB: > { %s1622_s13 = smov [#allocation5]   ;;  %s1710_s15 = sadd.s32 4294967295, %s1620_s12   ;;  %s1620_s12 = sphi %s1695_s12, %s2121_s12   ;;  %s1616_s11 = sphi %s1693_s11, %s2120_s11   ;;  %s1612_s10 = sphi %s1691_s10, %s2119_s10   ;;  %s1608_s30 = sphi %s1689_s30, %s2118_s30  }
   0xd   : > { %s266_s14 = sshll.u32 %s1622_s13, 4  ;;  %p1040_p0 = scmp.ge.s32.totalorder %s1620_s12, 1  ;;  %s1715_s14 = int_to_ptr.vmem [resolvable:$true] %s266_s14 }
   0xe   : > { %p2089_p1 = scmp.eq.s32.totalorder %s1710_s15, 0  ;;  %p254_p2 = scmp.lt.s32.totalorder %s1620_s12, 3 }
   0xf   : > { %s1623_s17 = smov [#allocation8]   ;;  %s1624_s20 = smov [#allocation11]  }
  0x10   : > { %p1717_p3 = pnand %p1040_p0, %p254_p2  ;;  %s292_s18 = sshll.u32 %s1623_s17, 4  ;;  %s1730_s18 = int_to_ptr.vmem [resolvable:$true] %s292_s18 }
  0x11   : > { %s318_s21 = sshll.u32 %s1624_s20, 4  ;;  %s2097_s1 = sld [smem:[#allocation23_spill]]  ;;  %s1732_s21 = int_to_ptr.vmem [resolvable:$true] %s318_s21 }
  0x12   : > { %s2095_s16 = scalar_select %p1717_p3, 1, 0 }
  0x13   : > { %p1219_p5 = pneg %p1717_p3 }
  0x15   : > { %p1726_p6 = pnand %p1219_p5, %p2089_p1 }
  0x17   : > { %s1312_s24 = scalar_lea.hbm %s2097_s1, 512  ;;  %p1742_p8 = pneg %p1726_p6 }
  0x18   : > { %p1313_p7 = scmp.ne.s32.totalorder %s2097_s1, %s1312_s24  ;;  %p1319_p11 = scmp.lt.u32.totalorder %s1312_s24, %s2097_s1 }
  0x1a   : > { %p1315_p9 = pnand %p1742_p8, %p1313_p7 }
  0x1c   : > { %p1316_p10 = pneg %p1315_p9 }
  0x1e   : > { %p1321_p12 = pnand %p1319_p11, %p1316_p10 }
  0x20   : > { %1324 = shalt.err (!%p1321_p12)
}
  0x21   : > { %s1325_s13 = scalar_lea.vmem %s1715_s14, 512  ;;  %p1333_p5 = scmp.lt.s32.totalorder %s1715_s14, %s1715_s14 }
  0x22   : > { %p1326_p13 = scmp.ne.s32.totalorder %s1715_s14, %s1325_s13  ;;  %p1334_p4 = scmp.lt.s32.totalorder %s1325_s13, %s1325_s13 }
  0x24   : > { %p1328_p0 = pnand %p1326_p13, %p1742_p8  ;;  %p1335_p7 = por %p1334_p4, %p1333_p5 }
  0x26   : > { %p1329_p2 = pneg %p1328_p0 }
  0x28   : > { %p1336_p9 = pnand %p1335_p7, %p1329_p2 }
  0x2a   : > { %1339 = shalt.err (!%p1336_p9)
}
  0x2b   : > { %s2091_s17 = smov 128   ;;  %s1626_s20 = smov 8  }
  0x2c   : > { %1222 = dma.hbm_to_vmem [thread:$0]  (!%p1726_p6), %s2097_s1, 512, %s1715_s14, [#allocation6], %s2091_s17, %s2091_s17, %s1626_s20  }
  0x2d   : > { %s1340_s26 = scalar_lea.hbm %s2081_s3, 256 }
  0x2e   : > { %p1341_p4 = scmp.ne.s32.totalorder %s2081_s3, %s1340_s26  ;;  %p1347_p12 = scmp.lt.u32.totalorder %s1340_s26, %s2081_s3 }
  0x30   : > { %p1343_p10 = pnand %p1341_p4, %p1742_p8 }
  0x32   : > { %p1344_p11 = pneg %p1343_p10 }
  0x34   : > { %p1349_p13 = pnand %p1347_p12, %p1344_p11 }
  0x36   : > { %1352 = shalt.err (!%p1349_p13)
}
  0x37   : > { %s1353_s14 = scalar_lea.vmem %s1730_s18, 256  ;;  %p1361_p7 = scmp.lt.s32.totalorder %s1730_s18, %s1730_s18 }
  0x38   : > { %p1354_p0 = scmp.ne.s32.totalorder %s1730_s18, %s1353_s14  ;;  %p1362_p9 = scmp.lt.s32.totalorder %s1353_s14, %s1353_s14 }
  0x3a   : > { %p1356_p2 = pnand %p1354_p0, %p1742_p8  ;;  %p1363_p4 = por %p1362_p9, %p1361_p7 }
  0x3c   : > { %p1357_p5 = pneg %p1356_p2 }
  0x3e   : > { %p1364_p10 = pnand %p1363_p4, %p1357_p5 }
  0x40   : > { %1367 = shalt.err (!%p1364_p10)
}
  0x41   : > { %1228 = dma.hbm_to_vmem [thread:$0]  (!%p1726_p6), %s2081_s3, 256, %s1730_s18, [#allocation9], %s2091_s17, %s2091_s17, %s1626_s20  }
  0x42   : > { %s1368_s25 = scalar_lea.hbm %s2083_s5, 512 }
  0x43   : > { %p1369_p11 = scmp.ne.s32.totalorder %s2083_s5, %s1368_s25  ;;  %p1375_p0 = scmp.lt.u32.totalorder %s1368_s25, %s2083_s5 }
  0x45   : > { %p1371_p12 = pnand %p1369_p11, %p1742_p8 }
  0x47   : > { %p1372_p13 = pneg %p1371_p12 }
  0x49   : > { %p1377_p2 = pnand %p1375_p0, %p1372_p13 }
  0x4b   : > { %1380 = shalt.err (!%p1377_p2)
}
  0x4c   : > { %s1381_s18 = scalar_lea.vmem %s1732_s21, 512  ;;  %p1389_p4 = scmp.lt.s32.totalorder %s1732_s21, %s1732_s21 }
  0x4d   : > { %p1382_p5 = scmp.ne.s32.totalorder %s1732_s21, %s1381_s18  ;;  %p1390_p10 = scmp.lt.s32.totalorder %s1381_s18, %s1381_s18 }
  0x4f   : > { %p1384_p7 = pnand %p1382_p5, %p1742_p8  ;;  %p1391_p11 = por %p1390_p10, %p1389_p4 }
  0x51   : > { %p1385_p9 = pneg %p1384_p7 }
  0x53   : > { %p1392_p12 = pnand %p1391_p11, %p1385_p9 }
  0x55   : > { %1395 = shalt.err (!%p1392_p12)
}
  0x56   : > { %1234 = dma.hbm_to_vmem [thread:$0]  (!%p1726_p6), %s2083_s5, 512, %s1732_s21, [#allocation12], %s2091_s17, %s2091_s17, %s1626_s20  }
  0x57   : > { %s1627_s22 = smov [#allocation7]   ;;  %s1628_s24 = smov [#allocation10]  }
  0x58   : > { %s279_s23 = sshll.u32 %s1627_s22, 4  ;;  %s305_s25 = sshll.u32 %s1628_s24, 4  ;;  %s280_s23 = int_to_ptr.vmem [resolvable:$true] %s279_s23  ;;  %s306_s25 = int_to_ptr.vmem [resolvable:$true] %s305_s25 }
  0x59   : > { %s1396_s29 = scalar_lea.hbm %s2080_s2, 256 }
  0x5a   : > { %p1397_p13 = scmp.ne.s32.totalorder %s2080_s2, %s1396_s29  ;;  %p1403_p5 = scmp.lt.u32.totalorder %s1396_s29, %s2080_s2 }
  0x5c   : > { %p1399_p0 = pnand %p1397_p13, %p1742_p8 }
  0x5e   : > { %p1400_p2 = pneg %p1399_p0 }
  0x60   : > { %p1405_p7 = pnand %p1403_p5, %p1400_p2 }
  0x62   : > { %1408 = shalt.err (!%p1405_p7)
}
  0x63   : > { %s1409_s21 = scalar_lea.vmem %s280_s23, 256  ;;  %p1417_p11 = scmp.lt.s32.totalorder %s280_s23, %s280_s23 }
  0x64   : > { %p1410_p9 = scmp.ne.s32.totalorder %s280_s23, %s1409_s21  ;;  %p1418_p12 = scmp.lt.s32.totalorder %s1409_s21, %s1409_s21 }
  0x66   : > { %p1412_p4 = pnand %p1410_p9, %p1742_p8  ;;  %p1419_p1 = por %p1418_p12, %p1417_p11 }
  0x68   : > { %p1413_p10 = pneg %p1412_p4 }
  0x6a   : > { %p1420_p3 = pnand %p1419_p1, %p1413_p10 }
  0x6c   : > { %1423 = shalt.err (!%p1420_p3)
}
  0x6d   : > { %1225 = dma.hbm_to_vmem [thread:$0]  (!%p1726_p6), %s2080_s2, 256, %s280_s23, [#allocation6], %s2091_s17, %s2091_s17, %s1626_s20  }
  0x6e   : > { %s1424_s26 = scalar_lea.hbm %s2082_s4, 256 }
  0x6f   : > { %p1425_p1 = scmp.ne.s32.totalorder %s2082_s4, %s1424_s26  ;;  %p1431_p0 = scmp.lt.u32.totalorder %s1424_s26, %s2082_s4 }
  0x71   : > { %p1427_p3 = pnand %p1425_p1, %p1742_p8 }
  0x73   : > { %p1428_p13 = pneg %p1427_p3 }
  0x75   : > { %p1433_p2 = pnand %p1431_p0, %p1428_p13 }
  0x77   : > { %1436 = shalt.err (!%p1433_p2)
}
  0x78   : > { %s1437_s14 = scalar_lea.vmem %s306_s25, 256  ;;  %p1445_p4 = scmp.lt.s32.totalorder %s306_s25, %s306_s25 }
  0x79   : > { %p1438_p5 = scmp.ne.s32.totalorder %s306_s25, %s1437_s14  ;;  %p1446_p10 = scmp.lt.s32.totalorder %s1437_s14, %s1437_s14 }
  0x7b   : > { %p1440_p7 = pnand %p1438_p5, %p1742_p8  ;;  %p1447_p11 = por %p1446_p10, %p1445_p4 }
  0x7d   : > { %p1441_p9 = pneg %p1440_p7 }
  0x7f   : > { %p1448_p12 = pnand %p1447_p11, %p1441_p9 }
  0x81   : > { %1451 = shalt.err (!%p1448_p12)
}
  0x82   : > { %1231 = dma.hbm_to_vmem [thread:$0]  (!%p1726_p6), %s2082_s4, 256, %s306_s25, [#allocation9], %s2091_s17, %s2091_s17, %s1626_s20  }
  0x83   : > { %s1629_s1 = smov [#allocation13]   ;;  %s1630_s22 = smov [#allocation14]  }
  0x84   : > { %s331_s9 = sshll.u32 %s1629_s1, 4  ;;  %s344_s24 = sshll.u32 %s1630_s22, 4  ;;  %s332_s9 = int_to_ptr.vmem [resolvable:$true] %s331_s9  ;;  %s345_s24 = int_to_ptr.vmem [resolvable:$true] %s344_s24 }
  0x85   : > { %s1452_s29 = scalar_lea.hbm %s2084_s6, 512 }
  0x86   : > { %p1453_p1 = scmp.ne.s32.totalorder %s2084_s6, %s1452_s29  ;;  %p1459_p0 = scmp.lt.u32.totalorder %s1452_s29, %s2084_s6 }
  0x88   : > { %p1455_p3 = pnand %p1453_p1, %p1742_p8 }
  0x8a   : > { %p1456_p13 = pneg %p1455_p3 }
  0x8c   : > { %p1461_p2 = pnand %p1459_p0, %p1456_p13 }
  0x8e   : > { %1464 = shalt.err (!%p1461_p2)
}
  0x8f   : > { %s1465_s25 = scalar_lea.vmem %s332_s9, 512  ;;  %p1473_p4 = scmp.lt.s32.totalorder %s332_s9, %s332_s9 }
  0x90   : > { %p1466_p5 = scmp.ne.s32.totalorder %s332_s9, %s1465_s25  ;;  %p1474_p10 = scmp.lt.s32.totalorder %s1465_s25, %s1465_s25 }
  0x92   : > { %p1468_p7 = pnand %p1466_p5, %p1742_p8  ;;  %p1475_p11 = por %p1474_p10, %p1473_p4 }
  0x94   : > { %p1469_p9 = pneg %p1468_p7 }
  0x96   : > { %p1476_p12 = pnand %p1475_p11, %p1469_p9 }
  0x98   : > { %1479 = shalt.err (!%p1476_p12)
}
  0x99   : > { %1237 = dma.hbm_to_vmem [thread:$0]  (!%p1726_p6), %s2084_s6, 512, %s332_s9, [#allocation12], %s2091_s17, %s2091_s17, %s1626_s20  }
  0x9a   : > { %s1480_s28 = scalar_lea.hbm %s2085_s7, 512 }
  0x9b   : > { %p1481_p1 = scmp.ne.s32.totalorder %s2085_s7, %s1480_s28  ;;  %p1487_p0 = scmp.lt.u32.totalorder %s1480_s28, %s2085_s7 }
  0x9d   : > { %p1483_p3 = pnand %p1481_p1, %p1742_p8 }
  0x9f   : > { %p1484_p13 = pneg %p1483_p3 }
  0xa1   : > { %p1489_p2 = pnand %p1487_p0, %p1484_p13 }
  0xa3   : > { %1492 = shalt.err (!%p1489_p2)
}
  0xa4   : > { %s1493_s23 = scalar_lea.vmem %s345_s24, 512  ;;  %p1501_p4 = scmp.lt.s32.totalorder %s345_s24, %s345_s24 }
  0xa5   : > { %p1494_p5 = scmp.ne.s32.totalorder %s345_s24, %s1493_s23  ;;  %p1502_p10 = scmp.lt.s32.totalorder %s1493_s23, %s1493_s23 }
  0xa7   : > { %p1496_p7 = pnand %p1494_p5, %p1742_p8  ;;  %p1503_p11 = por %p1502_p10, %p1501_p4 }
  0xa9   : > { %p1497_p9 = pneg %p1496_p7 }
  0xab   : > { %p1504_p12 = pnand %p1503_p11, %p1497_p9 }
  0xad   : > { %1507 = shalt.err (!%p1504_p12)
}
  0xae   : > { %1240 = dma.hbm_to_vmem [thread:$0]  (!%p1726_p6), %s2085_s7, 512, %s345_s24, [#allocation15], %s2091_s17, %s2091_s17, %s1626_s20  }
  0xaf   : > { %s1039_s19 = sadd.s32 4294967294, %s1620_s12   ;;  %s1904_s27 = sadd.s32 1, %s1620_s12  }
  0xb0   : > { %s36_s21 = sadd.s32 1, %s1616_s11  ;;  %s33_s1 = ssub.s32 %s1620_s12, %s1904_s27 }
  0xb1   : > { %p43_p8 = scmp.ne.s32.totalorder %s1616_s11, %s1612_s10  ;;  %p34_p1 = scmp.eq.s32.totalorder %s33_s1, 0 }
  0xb2   : > { %p44_p3 = scmp.eq.s32.totalorder %s1620_s12, 0  ;;  %p49_p13 = scmp.ne.s32.totalorder %s1612_s10, %s1608_s30 }
  0xb3   : > { %p241_p0 = scmp.eq.s32.totalorder %s1710_s15, 1  ;;  %p2099_p5 = scmp.eq.s32.totalorder %s1710_s15, 0 }
  0xb4   : > { %s1916_s22 = scalar_select %p34_p1, %s1616_s11, %s36_s21  }
  0xb5   : > { %p45_p2 = por %p44_p3, %p43_p8  ;;  %p1920_p7 = por %p2099_p5, %p49_p13 }
  0xb6   : > { %p1924_p6 = por %p241_p0, %p43_p8  ;;  %p247_p9 = scmp.eq.s32.totalorder %s1039_s19, 1 }
  0xb7   : > { %p1256_p4 = scmp.lt.s32.totalorder %s1620_s12, 2  ;;  %s361_s28 = sand.u32 1, %s1616_s11  }
  0xb8   : > { %s2101_s24 = scalar_select %p1924_p6, 1, 0 }
  0xb9   : > { %p1930_p10 = por %p247_p9, %p49_p13  ;;  %s1049_s13 = sshll.u32 %s361_s28, 4 }
  0xba   : > { %s1075_s18 = sshll.u32 %s1620_s12, 8  ;;  %s365_s25 = scalar_lea.vmem [#allocation2], %s1049_s13 }
  0xbb   : > { %s2102_s29 = scalar_select %p1930_p10, 1, 0 }
  0xbc   : > { %s1938_s9 = scalar_lea.hbm %s2078_s0, %s1075_s18  ;;  %s372_s21 = sshll.u32 %s365_s25, 4  ;;  %s1944_s21 = int_to_ptr.vmem [resolvable:$true] %s372_s21 }
  0xbd   : > { %p1940_p11 = pnand %p1256_p4, %p45_p2  ;;  %s1946_s1 = scalar_lea.sflag [#allocation3], %s361_s28 }
  0xbe   : > { %s1508_s17 = scalar_lea.hbm %s1938_s9, 256  ;;  %s1513_s14 = scalar_lea.hbm %s2078_s0, 512 }
  0xbf   : > { %p1509_p12 = scmp.ne.s32.totalorder %s1938_s9, %s1508_s17  ;;  %p1510_p8 = pneg %p1940_p11 }
  0xc0   : > { %p1514_p13 = scmp.lt.u32.totalorder %s1938_s9, %s2078_s0  ;;  %p1515_p0 = scmp.lt.u32.totalorder %s1513_s14, %s1508_s17 }
  0xc1   : > { %p1511_p1 = pnand %p1510_p8, %p1509_p12  ;;  %p1517_p5 = scmp.lt.u32.totalorder %s1508_s17, %s1938_s9 }
  0xc2   : > { %p1516_p2 = por %p1515_p0, %p1514_p13 }
  0xc3   : > { %p1512_p3 = pneg %p1511_p1 }
  0xc4   : > { %p1518_p9 = por %p1517_p5, %p1516_p2 }
  0xc6   : > { %p1519_p4 = pnand %p1518_p9, %p1512_p3 }
  0xc8   : > { %1522 = shalt.err (!%p1519_p4)
}
  0xc9   : > { %s1523_s28 = scalar_lea.vmem %s1944_s21, 256  ;;  %s1631_s13 = smov [#allocation2]  }
  0xca   : > { %p1524_p12 = scmp.ne.s32.totalorder %s1944_s21, %s1523_s28  ;;  %s1528_s18 = sshll.u32 %s1631_s13, 4  ;;  %s1529_s18 = int_to_ptr.vmem [resolvable:$false] %s1528_s18 }
  0xcb   : > { %s1530_s23 = scalar_lea.vmem %s1529_s18, 512  ;;  %p1531_p6 = scmp.lt.s32.totalorder %s1944_s21, %s1529_s18 }
  0xcc   : > { %p1526_p1 = pnand %p1524_p12, %p1510_p8  ;;  %p1532_p13 = scmp.lt.s32.totalorder %s1530_s23, %s1523_s28 }
  0xce   : > { %p1527_p10 = pneg %p1526_p1  ;;  %p1533_p0 = por %p1532_p13, %p1531_p6 }
  0xd0   : > { %p1534_p2 = pnand %p1533_p0, %p1527_p10 }
  0xd2   : > { %1537 = shalt.err (!%p1534_p2)
}
  0xd3   : > { %s2104_s17 = smov 128   ;;  %p2105_p8 = scmp.ne.s32.totalorder %s2095_s16, 0 }
  0xd4   : > { %1244 = dma.hbm_to_vmem [thread:$0]  (!%p1940_p11), %s1938_s9, 256, %s1944_s21, %s1946_s1, %s2104_s17, %s2104_s17, %s1626_s20  }
  0xd5   : > { %384 = sbr.rel (%p2105_p8) target bundleno = 1126 (0x466), region = 56  ;;  %s1980_s14 = sand.u32 (!%p2105_p8), 1, %s1612_s10  }
  0xd6   : > { %s1053_s25 = sshll.u32 (!%p2105_p8), %s1980_s14, 4  ;;  %s387_s28 = scalar_lea.sflag (!%p2105_p8), [#allocation3], %s1980_s14 }
  0xd7   : > { %s1986_s19 = scalar_lea.vmem (!%p2105_p8), [#allocation2], %s1053_s25 }
  0xdc   : > { %1583 = dma.done.wait (%p1920_p7), %s387_s28, 256  }
  0xdd   : > { %1585 = vsyncadd (%p1920_p7), %s387_s28, 4294967040  ;;  %p2106_p6 = scmp.eq.s32.totalorder %s1710_s15, 0 }
  0xdf   : > { %1587 = dma.done.wait (%p2106_p6), [#allocation6], 768   ;;  %p2107_p10 = pmov %p2106_p6 }
  0xe0   : > { %p2108_p11 = pmov %p2106_p6 }
  0xe1   : > { %1589 = vsyncadd (%p2107_p10), [#allocation6], 4294966528 }
  0xe2   : > { %1591 = dma.done.wait (%p2108_p11), [#allocation9], 512   ;;  %p2109_p3 = pmov %p2106_p6 }
  0xe4   : > { %1593 = vsyncadd (%p2109_p3), [#allocation9], 4294966784  ;;  %p2110_p5 = pmov %p2109_p3 }
  0xe5   : > { %p2111_p9 = pmov %p2109_p3 }
  0xe6   : > { %1595 = dma.done.wait (%p2110_p5), [#allocation12], 1024  }
  0xe7   : > { %1597 = vsyncadd (%p2111_p9), [#allocation12], 4294966272  ;;  %p2112_p7 = pmov %p2109_p3 }
  0xe8   : > { %p2113_p4 = pmov %p2109_p3 }
  0xe9   : > { %1599 = dma.done.wait (%p2112_p7), [#allocation15], 512  }
  0xea   : > { %1601 = vsyncadd (%p2113_p4), [#allocation15], 4294966784  ;;  %vm459_vm0 = vcmask 261120   ;;  %v455_v0 = vld [vmem:[#allocation5] sm:$0xff]  ;;  %v456_v1 = vld [vmem:[#allocation5 + $0x8] sm:$0xff]  ;;  %v1632_v24 = vmov 0.0|0.0   ;;  %v879_v58 = vlaneseq }
  0xeb   : > { %v457_v2 = vld [vmem:[#allocation5 + $0x10] sm:$0xff]  ;;  %v1154_v3 = vpack.c.bf16 %v456_v1, %v455_v0  ;;  %v458_v4 = vld [vmem:[#allocation5 + $0x18] sm:$0xff]  ;;  %v549_v12 = vld [vmem:[#allocation11 + $0x10] sm:$0xff]  ;;  %vm1633_vm1 = vmmov 0   ;;  %v1634_v25 = vmov 0.0   ;;  %vm727_vm2 = vcmask 130048  }
  0xec   : > { %v453_v5 = vld [vmem:[%s1986_s19] sm:$0xff]  ;;  %v1158_v6 = vpack.c.bf16 %v458_v4, %v457_v2  ;;  %v548_v8 = vld [vmem:[#allocation11 + $0x8] sm:$0xff]  ;;  %v550_v13 = vld [vmem:[#allocation11 + $0x18] sm:$0xff]  ;;  %v1635_v54 = vmov 1.0   ;;  %v880_v59 = vshrl.u32 %v879_v58, 7  ;;  %s1076_s26 = sshll.u32 %s1710_s15, 8 }
  0xed   : > { %1111 = vmatprep.mubr.msk.f32.mxu0 %vm459_vm0, %v453_v5  ;;  %v547_v7 = vld [vmem:[#allocation11] sm:$0xff]  ;;  %1155 = vmatprep.subr.bf16.mxu0 %v1154_v3  ;;  %v633_v11 = vld [vmem:[#allocation13 + $0x8] sm:$0xff]  ;;  %v1166_v14 = vpack.c.bf16 %v550_v13, %v549_v12  ;;  %v634_v16 = vld [vmem:[#allocation13 + $0x10] sm:$0xff]  ;;  %s452_s9 = scalar_lea.vmem [#allocation16], %s1053_s25  ;;  %s2114_s18 = sld [smem:[#allocation24_spill]] }
  0xee   : > { %v632_v9 = vld [vmem:[#allocation13] sm:$0xff]  ;;  %v1162_v10 = vpack.c.bf16 %v548_v8, %v547_v7  ;;  %1157 = vmatpush3.bf16.msra.mxu0 %v1154_v3  ;;  %v635_v17 = vld [vmem:[#allocation13 + $0x18] sm:$0xff]  ;;  %v711_v30 = vld [vmem:[#allocation7] sm:$0xff]  ;;  %v881_v61 = vsub.s32 0, %v880_v59  ;;  %s899_s21 = sshll.u32 %s452_s9, 4  ;;  %s886_s15 = scalar_lea.sflag [#allocation4], %s1980_s14  ;;  %s2032_s21 = int_to_ptr.vmem [resolvable:$true] %s899_s21 }
  0xef   : > { %1159 = vmatprep.subr.bf16.mxu0 %v1158_v6  ;;  %v1170_v15 = vpack.c.bf16 %v633_v11, %v632_v9  ;;  %v454_v18 = vld [vmem:[%s1986_s19 + $0x8] sm:$0xff]  ;;  %v1174_v19 = vpack.c.bf16 %v635_v17, %v634_v16  ;;  %v715_v31 = vld [vmem:[#allocation10] sm:$0xff]  ;;  %v721_v38 = vld [vmem:[#allocation8] sm:$0xff]  ;;  %s1538_s17 = scalar_lea.vmem %s2032_s21, 256  ;;  %p2115_p1 = scmp.ne.s32.totalorder %s2101_s24, 0 }
  0xf0   : > { %1163 = vmatprep.subr.bf16.mxu1 %v1162_v10  ;;  %v712_v27 = vld [vmem:[#allocation7 + $0x8] sm:$0xff]  ;;  %v722_v33 = vld [vmem:[#allocation8 + $0x8] sm:$0xff]  ;;  %v801_v48 = vld [vmem:[#allocation14] sm:$0xff]  ;;  %p1539_p12 = scmp.ne.s32.totalorder %s2032_s21, %s1538_s17  ;;  %s1636_s25 = smov [#allocation16]  }
  0xf1   : > { %1165 = vmatpush3.bf16.msra.mxu1 %v1162_v10  ;;  %v716_v29 = vld [vmem:[#allocation10 + $0x8] sm:$0xff]  ;;  %v802_v49 = vld [vmem:[#allocation14 + $0x8] sm:$0xff]  ;;  %v803_v52 = vld [vmem:[#allocation14 + $0x10] sm:$0xff]  ;;  %s1542_s28 = sshll.u32 %s1636_s25, 4  ;;  %s1543_s28 = int_to_ptr.vmem [resolvable:$false] %s1542_s28 }
  0xf2   : > { %1167 = vmatprep.subr.bf16.mxu1 %v1166_v14  ;;  %1161 = vmatpush3.bf16.msra.mxu0 %v1158_v6  ;;  %v1182_v51 = vpack.c.bf16 %v802_v49, %v801_v48  ;;  %v804_v53 = vld [vmem:[#allocation14 + $0x18] sm:$0xff]  ;;  %v805_v60 = vld [vmem:[%s2086_s8] sm:$0x1]  ;;  %p1540_p13 = pnand %p1539_p12, %p2115_p1  ;;  %s1544_s19 = scalar_lea.vmem %s1543_s28, 512 }
  0xf3   : > { %1171 = vmatprep.subr.bf16.mxu0 %v1170_v15  ;;  %v1185_v55 = vpack.c.bf16 %v804_v53, %v803_v52  ;;  %s2030_s23 = scalar_lea.hbm %s2114_s18, %s1076_s26  ;;  %p1545_p2 = scmp.lt.s32.totalorder %s2032_s21, %s1543_s28 }
  0xf4   : > { %p1541_p0 = pneg %p1540_p13  ;;  %p1546_p8 = scmp.lt.s32.totalorder %s1544_s19, %s1538_s17 }
  0xf5   : > { %1169 = vmatpush3.bf16.msra.mxu1 %v1166_v14  ;;  %1112 = vmatmul.mubr.msk.f32.vlgmr.msra.gmra.mrb[0].mxu0 %vm459_vm0, %v454_v18 }
  0xf6   : > { %1173 = vmatpush3.bf16.msra.mxu0 %v1170_v15  ;;  %1178 = vmatprep.subr.bf16.mxu1 %v1632_v24  ;;  %p1547_p6 = por %p1546_p8, %p1545_p2 }
  0xf7   : > { %1175 = vmatprep.subr.bf16.mxu0 %v1174_v19 }
  0xf8   : > { %p1548_p10 = pnand %p1547_p6, %p1541_p0 }
  0xfa   : > { %1177 = vmatpush3.bf16.msra.mxu0 %v1174_v19 }
 0x1c8   : > { %v1113_v20 = vpop.f32.mrb[0].mxu0 }
 0x1c9   : > { %v532_v21 = vpop.f32.mrb[1].mxu0  ;;  %v544_v23 = vsel %vm459_vm0, %v1113_v20, 0.0 }
 0x1ca   : > { %1122 = vmatprep.mubr.msk.f32.mxu1 %vm459_vm0, %v532_v21  ;;  %1133 = vmatprep.mubr.msk.f32.mxu0 %vm459_vm0, %v532_v21  ;;  %v541_v22 = vsel %vm459_vm0, %v532_v21, 0.0 }
 0x1cb   : > { %1123 = vmatmul.mubr.msk.f32.vlgmr.msra.gmra.mrb[0].mxu1 %vm459_vm0, %v1113_v20  ;;  %1134 = vmatmul.mubr.msk.f32.vlgmr.msra.gmra.mrb[2].mxu0 %vm459_vm0, %v1113_v20 }
 0x1cc   : > { %542 = vadd.xlane.f32.xlu0 %v541_v22  ;;  %1140 = vmatprep.mubr.msk.f32.mxu1 %vm1633_vm1, %v1634_v25 }
 0x1d0   : > { %545 = vadd.xlane.f32.xlu0 %v544_v23 }
 0x259   : > { %v543_v26 = vpop.xlane.xlu0 %542 }
 0x25a   : > { %v713_v40 = vmul.f32 %v711_v30, %v543_v26 }
 0x25d   : > { %v546_v28 = vpop.xlane.xlu0 %545 }
 0x25e   : > { %v714_v35 = vmul.f32 %v712_v27, %v546_v28 }
 0x29e   : > { %v1124_v32 = vpop.f32.mrb[0].mxu1  ;;  %v1135_v34 = vpop.f32.mrb[2].mxu0 }
 0x29f   : > { %v718_v36 = vmul.f32 %v1135_v34, %v716_v29  ;;  %v623_v37 = vpop.f32.mrb[1].mxu1  ;;  %v702_v39 = vpop.f32.mrb[3].mxu0  ;;  %v724_v42 = vmul.f32 %v1124_v32, %v722_v33 }
 0x2a0   : > { %v717_v41 = vmul.f32 %v715_v31, %v702_v39  ;;  %v723_v44 = vmul.f32 %v721_v38, %v623_v37 }
 0x2a1   : > { %v720_v43 = vadd.f32 %v718_v36, %v714_v35 }
 0x2a2   : > { %v719_v45 = vadd.f32 %v717_v41, %v713_v40 }
 0x2a3   : > { %v726_v46 = vsub.f32 %v720_v43, %v724_v42 }
 0x2a4   : > { %v725_v47 = vsub.f32 %v719_v45, %v723_v44 }
 0x2a6   : > { %v1179_v50 = vpack.c.bf16 %v726_v46, %v725_v47 }
 0x2a8   : > { %1180 = vmatpush3.bf16.msra.mxu1 %v1179_v50 }
 0x2a9   : > { %1181 = vmatprep.subr.bf16.mxu1 %v1632_v24 }
 0x2ab   : > { %1141 = vmatmul.mubr.msk.f32.vlgmr.msra.gmra.mrb[2].mxu1 %vm727_vm2, %v1635_v54 }
 0x2ac   : > { %1183 = vmatpush3.bf16.msra.mxu1 %v1182_v51  ;;  %1151 = vmatprep.mubr.msk.f32.mxu1 %vm1633_vm1, %v1634_v25 }
 0x2ad   : > { %1184 = vmatprep.subr.bf16.mxu1 %v1632_v24 }
 0x2b0   : > { %1186 = vmatpush3.bf16.msra.mxu1 %v1185_v55 }
 0x37e   : > { %v797_v56 = vpop.f32.mrb[2].mxu1 }
 0x37f   : > { %v1142_v57 = vpop.f32.mrb[3].mxu1  ;;  %1152 = vmatmul.mubr.msk.f32.vlgmr.msra.gmra.mrb[4].mxu1 %vm459_vm0, %v797_v56 }
 0x452   : > { %v875_v62 = vpop.f32.mrb[4].mxu1 }
 0x453   : > { %v876_v63 = vadd.f32 %v875_v62, %v805_v60  ;;  %v1153_v0 = vpop.f32.mrb[5].mxu1 }
 0x455   : > { %v882_v1 = vrot.slane %v876_v63, %v881_v61 }
 0x457   : > { %883 = vst.msk [vmem:[%s452_s9] sm:$0xff] %vm459_vm0, %v882_v1  ;;  %884 = vst.msk [vmem:[%s452_s9 + $0x8] sm:$0xff] %vm459_vm0, %v882_v1 }
 0x458   : > { %1551 = shalt.err (!%p1548_p10)
}
 0x459   : > { %s1552_s16 = scalar_lea.hbm %s2030_s23, 256  ;;  %s1556_s9 = scalar_lea.hbm %s2114_s18, 512 }
 0x45a   : > { %p1553_p11 = scmp.ne.s32.totalorder %s2030_s23, %s1552_s16  ;;  %p1557_p9 = scmp.lt.u32.totalorder %s2030_s23, %s2114_s18 }
 0x45b   : > { %p1558_p7 = scmp.lt.u32.totalorder %s1556_s9, %s1552_s16  ;;  %p1560_p12 = scmp.lt.u32.totalorder %s1552_s16, %s2030_s23 }
 0x45c   : > { %p1554_p3 = pnand %p1553_p11, %p2115_p1 }
 0x45d   : > { %p1559_p4 = por %p1558_p7, %p1557_p9 }
 0x45e   : > { %p1555_p5 = pneg %p1554_p3 }
 0x45f   : > { %p1561_p13 = por %p1560_p12, %p1559_p4 }
 0x461   : > { %p1562_p0 = pnand %p1561_p13, %p1555_p5 }
 0x463   : > { %1565 = shalt.err (!%p1562_p0)
}
 0x464   : > { %s1637_s17 = smov 128   ;;  %s1638_s25 = smov 8  }
 0x465   : > { %1217 = dma.vmem_to_hbm [thread:$0]  (%p2115_p1), %s2032_s21, 256, %s2030_s23, %s886_s15, %s1637_s17, %s1637_s17, %s1638_s25  }
 0x466 PF: > { %s914_s28 = sand.u32 1, %s1608_s30   ;;  %p2116_p2 = scmp.ne.s32.totalorder %s2102_s29, 0 }
 0x467   : > { %p2117_p8 = scmp.ge.s32.totalorder %s1620_s12, 2  ;;  %s915_s19 = scalar_lea.sflag [#allocation4], %s914_s28 }
 0x469   : > { %p1246_p6 = pnand %p2117_p8, %p2116_p2 }
 0x46b   : > { %1603 = dma.done.wait (!%p1246_p6), %s915_s19, 256  }
 0x46c   : > { %1605 = vsyncadd (!%p1246_p6), %s915_s19, 4294967040  ;;  %p26_p10 = scmp.ge.s32.totalorder %s1904_s27, 4   ;;  %s2118_s30 = smov %s1612_s10 }
 0x46d   : > { %s2119_s10 = smov %s1616_s11  ;;  %s2120_s11 = smov %s1916_s22 }
 0x46e   : > { %s2121_s12 = smov %s1904_s27  ;;  %28 = sbr.rel (!%p26_p10) target bundleno = 12 (0xc), region = 129 }
 0x475   :  { %920 = vsyncpa [#allocation3], 1 }
 0x476   :  { %922 = vsyncpa [#allocation3 + $0x1], 1 }
 0x477   :  { %923 = vsyncpa [#allocation6], 1 }
 0x478   :  { %924 = vsyncpa [#allocation9], 1 }
 0x479   :  { %925 = vsyncpa [#allocation12], 1 }
 0x47a   :  { %926 = vsyncpa [#allocation15], 1 }
 0x47b   :  { %927 = vsyncpa [#allocation4], 1 }
 0x47c   :  { %929 = vsyncpa [#allocation4 + $0x1], 1 }

</bundles_post_ra>
